<compile_context>
chip_gen: v7x
topology: tpu7x:2x2x1
jax: 0.10.0
libtpu: 0.0.40
codegen_flags: <defaults>
</compile_context>

<pallas_src>
import jax
import jax.numpy as jnp
from jax.experimental import pallas as pl
from jax.experimental.pallas import tpu as pltpu


def _sublane_align(dtype) -> int:
    """Sublane tile alignment for a dtype: 8 (f32), 16 (bf16/f16), 32 (int8/fp8)."""
    itemsize = jnp.dtype(dtype).itemsize
    return 8 * max(1, 4 // itemsize)


def _pick_tile(length: int, cap: int, align: int) -> int:
    """Largest tile <= cap that evenly divides `length` and is `align`-aligned.

    Falls back to the full dimension (always a legal block) if no aligned
    divisor exists below the cap."""
    if length <= cap:
        return length
    t = (cap // align) * align
    while t >= align:
        if length % t == 0:
            return t
        t -= align
    return length


def _vmem_capacity_bytes() -> int:
    try:
        cap = int(getattr(pltpu.get_tpu_info(), "vmem_capacity_bytes", 0))
        if cap > 0:
            return cap
    except Exception:
        pass
    return 64 << 20  # conservative default (v7x per-TensorCore VMEM)


def _vmem_usage_bytes(bt, tq, tk, D, Dv, q_isz, k_isz, v_isz, o_isz) -> int:
    """Rough VMEM footprint: double-buffered blocks + scratch + live sim/p values."""
    dbuf = 2
    q_b = bt * tq * D * q_isz * dbuf
    k_b = bt * tk * D * k_isz * dbuf
    v_b = bt * tk * Dv * v_isz * dbuf
    o_b = bt * tq * Dv * o_isz * dbuf
    acc = bt * tq * Dv * 4
    rowsum = bt * tq * 128 * 4            # lane-padded (tq, 1) scratch
    live = 2 * bt * tq * tk * 4           # sim / p intermediates (vregs + spill)
    return q_b + k_b + v_b + o_b + acc + rowsum + live


def _choose_config(B, Lq, Lk, D, Dv, q_dtype, k_dtype, v_dtype, tq_cap, tk_cap):
    """Pick (bt, tq, tk, vmem_limit_bytes) gated by the generation's VMEM."""
    cap = _vmem_capacity_bytes()
    budget = int(cap * 0.6)

    q_isz = jnp.dtype(q_dtype).itemsize
    k_isz = jnp.dtype(k_dtype).itemsize
    v_isz = jnp.dtype(v_dtype).itemsize
    o_isz = q_isz

    align_q = _sublane_align(q_dtype)                                  # tq: sublane of q/out blocks
    align_k = max(_sublane_align(k_dtype), _sublane_align(v_dtype))    # tk: sublane of k/v blocks

    tq = _pick_tile(Lq, tq_cap, align_q)
    tk = _pick_tile(Lk, tk_cap, align_k)

    # Fuse several tiny batches per grid step to amortize the ~0.35us/step
    # overhead, but never collapse the parallel grid extent below 2 (keeps
    # both v7x TensorCores busy; harmless on 1-TC chips).
    bt = 1
    if Lq * Lk < 128 * 256:
        n_q = Lq // tq
        for cand in (8, 4, 2):
            if cand <= B and B % cand == 0 and (B // cand) * n_q >= 2:
                bt = cand
                break

    def usage(bt_, tq_, tk_):
        return _vmem_usage_bytes(bt_, tq_, tk_, D, Dv, q_isz, k_isz, v_isz, o_isz)

    # Shrink until the footprint fits the budget: drop batch fusion first,
    # then halve tk, then tq.
    for _ in range(64):
        if usage(bt, tq, tk) <= budget:
            break
        if bt > 1:
            bt = 1
            continue
        new_tk = _pick_tile(Lk, max(align_k, tk // 2), align_k)
        if new_tk < tk:
            tk = new_tk
            continue
        new_tq = _pick_tile(Lq, max(align_q, tq // 2), align_q)
        if new_tq < tq:
            tq = new_tq
            continue
        break  # cannot shrink further (awkward dims); run with what we have

    est = usage(bt, tq, tk)
    vmem_limit = int(min(int(cap * 0.9), max(48 << 20, 2 * est)))
    return bt, tq, tk, vmem_limit


def _make_attn_kernel(scale_val, softplus_dtype, mm_dtype):
    """scale_val: python float or None; softplus_dtype: dtype of the EUP-bound
    softplus; mm_dtype: optional bf16 downcast for the MXU operands (None =
    use native operand dtype)."""

    def kernel(q_ref, k_ref, v_ref, o_ref, acc_ref, rowsum_ref):
        kv = pl.program_id(2)

        @pl.when(kv == 0)
        def _init():
            acc_ref[...] = jnp.zeros_like(acc_ref)
            rowsum_ref[...] = jnp.zeros_like(rowsum_ref)

        q = q_ref[...]                                     # (bt, tq, D)
        k = k_ref[...]                                     # (bt, tk, D)
        v = v_ref[...]                                     # (bt, tk, Dv)
        if mm_dtype is not None:
            q = q.astype(mm_dtype)
            k = k.astype(mm_dtype)
            v = v.astype(mm_dtype)

        # q @ k^T contracting the LAST dims of both operands (no XLU transpose);
        # MXU matmul with f32 accumulation via preferred_element_type.
        sim = jnp.einsum("bqd,bkd->bqk", q, k,
                         preferred_element_type=jnp.float32)   # (bt, tq, tk) f32

        if scale_val is not None:
            # Exact f32 scaling of sim (matches the reference order; VALU has slack).
            sim = sim * scale_val

        # softplus(x) + eps.  This is the binding EUP work (exp + log per sim
        # element); for bf16 inputs it runs in bf16 (packed EUP path on v6e/v7x
        # -> ~2x transcendental throughput).  The row-sum renormalization keeps
        # the relative error contained.
        sp = jnp.logaddexp(0.0, sim.astype(softplus_dtype))
        p = sp.astype(jnp.float32) + 1e-8                      # (bt, tq, tk) f32

        rowsum_ref[...] += jnp.sum(p, axis=-1, keepdims=True)
        acc_ref[...] += jnp.einsum("bqk,bkd->bqd", p.astype(v.dtype), v,
                                   preferred_element_type=jnp.float32)

        @pl.when(kv == pl.num_programs(2) - 1)
        def _finalize():
            s = rowsum_ref[...]
            r = pl.reciprocal(s, approx=True)       # EUP slot (cheap)
            r = r * (2.0 - s * r)                   # one Newton step -> ~f32-exact 1/s
            o_ref[...] = (acc_ref[...] * r).astype(o_ref.dtype)

    return kernel


def scaled_dot_product_attention(q, k, v, scale=None, *,
                                 tq_cap=512, tk_cap=1024,
                                 fast_softplus=False, bf16_matmul=False):
    """q: (B, Lq, D), k: (B, Lk, D), v: (B, Lk, Dv) -> (B, Lq, Dv)."""
    B, Lq, D = q.shape
    Bk, Lk, Dk = k.shape
    Bv, Lkv, Dv = v.shape
    assert B == Bk == Bv and D == Dk and Lk == Lkv

    # `if scale:` in the torch code -> identity when scale is falsy.
    scale_val = float(scale) if scale else None

    bt, tq, tk, vmem_limit = _choose_config(
        B, Lq, Lk, D, Dv, q.dtype, k.dtype, v.dtype, tq_cap, tk_cap)
    grid = (B // bt, Lq // tq, Lk // tk)

    low_precision_in = jnp.dtype(q.dtype).itemsize < 4
    softplus_dtype = jnp.bfloat16 if (low_precision_in or fast_softplus) else jnp.float32
    # Optionally feed the MXU bf16 operands for f32 inputs (3-6x MXU throughput
    # on the bf16-native MXUs); off by default to keep f32 results exact.
    mm_dtype = jnp.bfloat16 if (bf16_matmul and not low_precision_in) else None

    flops = 2 * B * Lq * Lk * (D + Dv)
    transcendentals = 2 * B * Lq * Lk          # exp + log per sim element
    n_q_tiles = Lq // tq
    bytes_accessed = (q.size * q.dtype.itemsize
                      + B * Lq * Dv * q.dtype.itemsize
                      + n_q_tiles * (k.size * k.dtype.itemsize
                                     + v.size * v.dtype.itemsize))

    return pl.pallas_call(
        _make_attn_kernel(scale_val, softplus_dtype, mm_dtype),
        out_shape=jax.ShapeDtypeStruct((B, Lq, Dv), q.dtype),
        grid_spec=pltpu.PrefetchScalarGridSpec(
            num_scalar_prefetch=0,
            grid=grid,
            in_specs=[
                pl.BlockSpec((bt, tq, D), lambda b, i, j: (b, i, 0)),    # q tile
                pl.BlockSpec((bt, tk, D), lambda b, i, j: (b, j, 0)),    # k tile
                pl.BlockSpec((bt, tk, Dv), lambda b, i, j: (b, j, 0)),   # v tile
            ],
            out_specs=pl.BlockSpec((bt, tq, Dv), lambda b, i, j: (b, i, 0)),
            scratch_shapes=[
                pltpu.VMEM((bt, tq, Dv), jnp.float32),   # output accumulator
                pltpu.VMEM((bt, tq, 1), jnp.float32),    # row-sum accumulator
            ],
        ),
        compiler_params=pltpu.CompilerParams(
            dimension_semantics=("parallel", "parallel", "arbitrary"),
            vmem_limit_bytes=vmem_limit,
        ),
        cost_estimate=pl.CostEstimate(
            flops=flops,
            transcendentals=transcendentals,
            bytes_accessed=bytes_accessed,
        ),
    )(q, k, v)


def _reference(q, k, v, scale):
    sim = jnp.einsum("bqd,bkd->bqk", q, k)
    if scale:
        sim = sim * scale
    sim = jax.nn.softplus(sim) + 1e-8
    sim = sim / jnp.sum(sim, axis=2, keepdims=True)
    return jnp.einsum("bqk,bkd->bqd", sim, v)


if __name__ == "__main__":
    key = jax.random.PRNGKey(0)

    # --- Test 1: tiny shapes (matches the module's toy usage), f32.
    kq, kk, kv_ = jax.random.split(key, 3)
    B, Lq, Lk, D, Dv = 2, 8, 16, 32, 32
    q = jax.random.normal(kq, (B, Lq, D), dtype=jnp.float32)
    k = jax.random.normal(kk, (B, Lk, D), dtype=jnp.float32)
    v = jax.random.normal(kv_, (B, Lk, Dv), dtype=jnp.float32)
    scale = 1.0 / (D ** 0.5)

    out = scaled_dot_product_attention(q, k, v, scale)
    jax.block_until_ready(out)
    ref = _reference(q, k, v, scale)
    assert out.shape == (B, Lq, Dv)
    assert jnp.allclose(out, ref, atol=1e-5, rtol=1e-5), \
        f"max err {jnp.max(jnp.abs(out - ref))}"

    # --- Test 2: exercise the blocked (Lq/Lk-tiled) accumulation path, f32.
    kq2, kk2, kv2 = jax.random.split(jax.random.PRNGKey(1), 3)
    B2, Lq2, Lk2, D2, Dv2 = 2, 128, 256, 64, 64
    q2 = jax.random.normal(kq2, (B2, Lq2, D2), dtype=jnp.float32)
    k2 = jax.random.normal(kk2, (B2, Lk2, D2), dtype=jnp.float32)
    v2 = jax.random.normal(kv2, (B2, Lk2, Dv2), dtype=jnp.float32)
    scale2 = 1.0 / (D2 ** 0.5)

    out2 = scaled_dot_product_attention(q2, k2, v2, scale2, tq_cap=64, tk_cap=128)
    jax.block_until_ready(out2)
    ref2 = _reference(q2, k2, v2, scale2)
    assert jnp.allclose(out2, ref2, atol=1e-4, rtol=1e-4), \
        f"max err {jnp.max(jnp.abs(out2 - ref2))}"

    # --- Test 3: native-bf16 path (bf16 MXU operands + bf16 EUP softplus,
    # f32 accumulation in-kernel).
    q3 = q2.astype(jnp.bfloat16)
    k3 = k2.astype(jnp.bfloat16)
    v3 = v2.astype(jnp.bfloat16)
    out3 = scaled_dot_product_attention(q3, k3, v3, scale2)
    jax.block_until_ready(out3)
    ref3 = _reference(q3.astype(jnp.float32), k3.astype(jnp.float32),
                      v3.astype(jnp.float32), scale2)
    assert jnp.allclose(out3.astype(jnp.float32), ref3, atol=5e-2, rtol=5e-2), \
        f"max err {jnp.max(jnp.abs(out3.astype(jnp.float32) - ref3))}"

    print("KERNEL_OK")
</pallas_src>

<mosaic_0001>
module attributes {stable_mosaic.version = 11 : i64} {
  func.func @kernel(%arg0: i32, %arg1: i32, %arg2: i32, %arg3: memref<1x8x32xf32, #tpu.memory_space<vmem>>, %arg4: memref<1x16x32xf32, #tpu.memory_space<vmem>>, %arg5: memref<1x16x32xf32, #tpu.memory_space<vmem>>, %arg6: memref<1x8x32xf32, #tpu.memory_space<vmem>>, %arg7: memref<1x8x32xf32, #tpu.memory_space<vmem>>, %arg8: memref<1x8x1xf32, #tpu.memory_space<vmem>>) attributes {dimension_semantics = [#tpu.dimension_semantics<parallel>, #tpu.dimension_semantics<parallel>, #tpu.dimension_semantics<arbitrary>], iteration_bounds = array<i64: 2, 1, 1>, scalar_prefetch = 0 : i64, scratch_operands = 2 : i64, tpu.core_type = #tpu.core_type<tc>, window_params = [{transform_indices = @transform_0, window_bounds = array<i64: 1, 8, 32>}, {transform_indices = @transform_1, window_bounds = array<i64: 1, 16, 32>}, {transform_indices = @transform_2, window_bounds = array<i64: 1, 16, 32>}, {transform_indices = @transform_3, window_bounds = array<i64: 1, 8, 32>}]} {
    %c0_i32 = arith.constant 0 : i32
    %0 = arith.cmpi eq, %arg2, %c0_i32 : i32
    %1 = arith.extui %0 : i1 to i32
    %c0_i32_0 = arith.constant 0 : i32
    %2 = arith.cmpi ne, %1, %c0_i32_0 : i32
    scf.if %2 {
      %cst_29 = arith.constant 0.000000e+00 : f32
      %37 = vector.broadcast %cst_29 : f32 to vector<1x8x32xf32>
      %c0_30 = arith.constant 0 : index
      %c0_31 = arith.constant 0 : index
      %c0_32 = arith.constant 0 : index
      %38 = vector.load %arg7[%c0_30, %c0_31, %c0_32] : memref<1x8x32xf32, #tpu.memory_space<vmem>>, vector<1x8x32xf32>
      tpu.vector_store %arg7[%c0_30, %c0_31, %c0_32], %37 {strides = array<i32>} : memref<1x8x32xf32, #tpu.memory_space<vmem>>, vector<1x8x32xf32>,
      %cst_33 = arith.constant 0.000000e+00 : f32
      %39 = vector.broadcast %cst_33 : f32 to vector<1x8x1xf32>
      %c0_34 = arith.constant 0 : index
      %c0_35 = arith.constant 0 : index
      %c0_36 = arith.constant 0 : index
      %40 = vector.load %arg8[%c0_34, %c0_35, %c0_36] : memref<1x8x1xf32, #tpu.memory_space<vmem>>, vector<1x8x1xf32>
      tpu.vector_store %arg8[%c0_34, %c0_35, %c0_36], %39 {strides = array<i32>} : memref<1x8x1xf32, #tpu.memory_space<vmem>>, vector<1x8x1xf32>,
    } else {
    }
    %c0 = arith.constant 0 : index
    %c0_1 = arith.constant 0 : index
    %c0_2 = arith.constant 0 : index
    %3 = vector.load %arg3[%c0, %c0_1, %c0_2] : memref<1x8x32xf32, #tpu.memory_space<vmem>>, vector<1x8x32xf32>
    %c0_3 = arith.constant 0 : index
    %c0_4 = arith.constant 0 : index
    %c0_5 = arith.constant 0 : index
    %4 = vector.load %arg4[%c0_3, %c0_4, %c0_5] : memref<1x16x32xf32, #tpu.memory_space<vmem>>, vector<1x16x32xf32>
    %c0_6 = arith.constant 0 : index
    %c0_7 = arith.constant 0 : index
    %c0_8 = arith.constant 0 : index
    %5 = vector.load %arg5[%c0_6, %c0_7, %c0_8] : memref<1x16x32xf32, #tpu.memory_space<vmem>>, vector<1x16x32xf32>
    "tpu.trace_start"() <{level = 10 : i32, message = "bqd,bkd->bqk"}> : () -> ()
    %cst = arith.constant dense<0.000000e+00> : vector<1x8x16xf32>
    %6 = tpu.matmul %3, %4, %cst {dimension_numbers = #tpu.dot_dimension_numbers<[2], [2], [1], [1], [0, 0, 0, 1, 1, 1], [0], [0]>} : vector<1x8x32xf32>, vector<1x16x32xf32>, vector<1x8x16xf32> -> vector<1x8x16xf32>
    "tpu.trace_stop"() : () -> ()
    %cst_9 = arith.constant 0.176776692 : f32
    %7 = vector.broadcast %cst_9 : f32 to vector<1x8x16xf32>
    %8 = arith.mulf %6, %7 : vector<1x8x16xf32>
    %cst_10 = arith.constant 0.000000e+00 : f32
    %9 = vector.broadcast %cst_10 : f32 to vector<1x8x16xf32>
    %10 = arith.maximumf %9, %8 : vector<1x8x16xf32>
    %11 = vector.broadcast %cst_10 : f32 to vector<1x8x16xf32>
    %12 = arith.subf %11, %8 : vector<1x8x16xf32>
    %13 = arith.cmpf one, %12, %12 : vector<1x8x16xf32>
    %14 = vector.broadcast %cst_10 : f32 to vector<1x8x16xf32>
    %15 = arith.addf %14, %8 : vector<1x8x16xf32>
    %16 = math.absf %12 : vector<1x8x16xf32>
    %cst_11 = arith.constant 0.000000e+00 : f32
    %17 = vector.broadcast %cst_11 : f32 to vector<1x8x16xf32>
    %18 = arith.subf %17, %16 : vector<1x8x16xf32>
    %19 = math.exp %18 : vector<1x8x16xf32>
    %20 = math.log1p %19 : vector<1x8x16xf32>
    %21 = arith.addf %10, %20 : vector<1x8x16xf32>
    %22 = arith.select %13, %15, %21 : vector<1x8x16xi1>, vector<1x8x16xf32>
    %cst_12 = arith.constant 9.99999993E-9 : f32
    %23 = vector.broadcast %cst_12 : f32 to vector<1x8x16xf32>
    %24 = arith.addf %22, %23 : vector<1x8x16xf32>
    %c0_13 = arith.constant 0 : index
    %c0_14 = arith.constant 0 : index
    %c0_15 = arith.constant 0 : index
    %25 = vector.load %arg8[%c0_13, %c0_14, %c0_15] : memref<1x8x1xf32, #tpu.memory_space<vmem>>, vector<1x8x1xf32>
    %cst_16 = arith.constant dense<0.000000e+00> : vector<1x8xf32>
    %26 = vector.multi_reduction <add>, %24, %cst_16 [2] : vector<1x8x16xf32> to vector<1x8xf32>
    %27 = vector.shape_cast %26 : vector<1x8xf32> to vector<1x8x1xf32>
    %28 = arith.addf %25, %27 : vector<1x8x1xf32>
    %c0_17 = arith.constant 0 : index
    %c0_18 = arith.constant 0 : index
    %c0_19 = arith.constant 0 : index
    %29 = vector.load %arg8[%c0_17, %c0_18, %c0_19] : memref<1x8x1xf32, #tpu.memory_space<vmem>>, vector<1x8x1xf32>
    tpu.vector_store %arg8[%c0_17, %c0_18, %c0_19], %28 {strides = array<i32>} : memref<1x8x1xf32, #tpu.memory_space<vmem>>, vector<1x8x1xf32>,
    %c0_20 = arith.constant 0 : index
    %c0_21 = arith.constant 0 : index
    %c0_22 = arith.constant 0 : index
    %30 = vector.load %arg7[%c0_20, %c0_21, %c0_22] : memref<1x8x32xf32, #tpu.memory_space<vmem>>, vector<1x8x32xf32>
    "tpu.trace_start"() <{level = 10 : i32, message = "bqk,bkd->bqd"}> : () -> ()
    %cst_23 = arith.constant dense<0.000000e+00> : vector<1x8x32xf32>
    %31 = tpu.matmul %24, %5, %cst_23 {dimension_numbers = #tpu.dot_dimension_numbers<[2], [1], [1], [2], [0, 0, 0, 1, 1, 2], [0], [0]>} : vector<1x8x16xf32>, vector<1x16x32xf32>, vector<1x8x32xf32> -> vector<1x8x32xf32>
    "tpu.trace_stop"() : () -> ()
    %32 = arith.addf %30, %31 : vector<1x8x32xf32>
    %c0_24 = arith.constant 0 : index
    %c0_25 = arith.constant 0 : index
    %c0_26 = arith.constant 0 : index
    %33 = vector.load %arg7[%c0_24, %c0_25, %c0_26] : memref<1x8x32xf32, #tpu.memory_space<vmem>>, vector<1x8x32xf32>
    tpu.vector_store %arg7[%c0_24, %c0_25, %c0_26], %32 {strides = array<i32>} : memref<1x8x32xf32, #tpu.memory_space<vmem>>, vector<1x8x32xf32>,
    %c0_i32_27 = arith.constant 0 : i32
    %34 = arith.cmpi eq, %arg2, %c0_i32_27 : i32
    %35 = arith.extui %34 : i1 to i32
    %c0_i32_28 = arith.constant 0 : i32
    %36 = arith.cmpi ne, %35, %c0_i32_28 : i32
    scf.if %36 {
      %c0_29 = arith.constant 0 : index
      %c0_30 = arith.constant 0 : index
      %c0_31 = arith.constant 0 : index
      %37 = vector.load %arg8[%c0_29, %c0_30, %c0_31] : memref<1x8x1xf32, #tpu.memory_space<vmem>>, vector<1x8x1xf32>
      %38 = tpu.reciprocal %37 {approx = true} : vector<1x8x1xf32> -> vector<1x8x1xf32>
      %39 = arith.mulf %37, %38 : vector<1x8x1xf32>
      %cst_32 = arith.constant 2.000000e+00 : f32
      %40 = vector.broadcast %cst_32 : f32 to vector<1x8x1xf32>
      %41 = arith.subf %40, %39 : vector<1x8x1xf32>
      %42 = arith.mulf %38, %41 : vector<1x8x1xf32>
      %c0_33 = arith.constant 0 : index
      %c0_34 = arith.constant 0 : index
      %c0_35 = arith.constant 0 : index
      %43 = vector.load %arg7[%c0_33, %c0_34, %c0_35] : memref<1x8x32xf32, #tpu.memory_space<vmem>>, vector<1x8x32xf32>
      %44 = vector.broadcast %42 : vector<1x8x1xf32> to vector<1x8x32xf32>
      %45 = arith.mulf %43, %44 : vector<1x8x32xf32>
      %c0_36 = arith.constant 0 : index
      %c0_37 = arith.constant 0 : index
      %c0_38 = arith.constant 0 : index
      %46 = vector.load %arg6[%c0_36, %c0_37, %c0_38] : memref<1x8x32xf32, #tpu.memory_space<vmem>>, vector<1x8x32xf32>
      tpu.vector_store %arg6[%c0_36, %c0_37, %c0_38], %45 {strides = array<i32>} : memref<1x8x32xf32, #tpu.memory_space<vmem>>, vector<1x8x32xf32>,
    } else {
    }
    return
  }
  func.func @transform_0(%arg0: i32, %arg1: i32, %arg2: i32) -> (i32, i32, i32) {
    %c0_i32 = arith.constant 0 : i32
    %c0_i32_0 = arith.constant 0 : i32
    return %arg0, %arg1, %c0_i32 : i32, i32, i32
  }
  func.func @transform_1(%arg0: i32, %arg1: i32, %arg2: i32) -> (i32, i32, i32) {
    %c0_i32 = arith.constant 0 : i32
    %c0_i32_0 = arith.constant 0 : i32
    return %arg0, %arg2, %c0_i32 : i32, i32, i32
  }
  func.func @transform_2(%arg0: i32, %arg1: i32, %arg2: i32) -> (i32, i32, i32) {
    %c0_i32 = arith.constant 0 : i32
    %c0_i32_0 = arith.constant 0 : i32
    return %arg0, %arg2, %c0_i32 : i32, i32, i32
  }
  func.func @transform_3(%arg0: i32, %arg1: i32, %arg2: i32) -> (i32, i32, i32) {
    %c0_i32 = arith.constant 0 : i32
    %c0_i32_0 = arith.constant 0 : i32
    return %arg0, %arg1, %c0_i32 : i32, i32, i32
  }
}

</mosaic_0001>

<bundles_post_ra>
// kernel: tpu_custom_call.1
= control target key start
LH: loop header
LB: loop body
LE: loop exit
PB: predicated region body
PF: predicated region fallthrough
CT: control target
= control target key end

     0   :  { %s1278_s0 = inlined_call_operand.hbm [shape: f32[2,8,32], index: 0, kind: input, shape index: {}]   ;;  %s1279_s1 = inlined_call_operand.hbm [shape: f32[2,16,32], index: 1, kind: input, shape index: {}]   ;;  %s1280_s2 = inlined_call_operand.hbm [shape: f32[2,16,32], index: 2, kind: input, shape index: {}]   ;;  %s1281_s3 = inlined_call_operand.hbm [shape: f32[2,8,32], index: 3, kind: output, shape index: {}]  }
   0x1   :  { %1289 = sst [smem:[#allocation17_spill]] %s1279_s1 }
   0x2   :  { %8 = vsyncpa [#allocation5], 0 }
   0x3   :  { %10 = vsyncpa [#allocation5 + $0x1], 0 }
   0x4   :  { %11 = vsyncpa [#allocation8], 0 }
   0x5   :  { %13 = vsyncpa [#allocation8 + $0x1], 0 }
   0x6   :  { %14 = vsyncpa [#allocation6], 0 }
   0x7   :  { %16 = vsyncpa [#allocation6 + $0x1], 0  ;;  %s1005_s12 = smov 0   ;;  %s1007_s13 = smov 0  }
   0x8   :  { %s1009_s14 = smov 0   ;;  %s1011_s15 = smov 0  }
   0x9   :  { %s1013_s16 = smov 0   ;;  %s1015_s17 = smov 0  }
   0xa LB: > { %1290 = sst [smem:[#allocation14_spill]] %s961_s14  ;;  %s1036_s18 = sadd.s32 4294967295, %s973_s17   ;;  %s973_s17 = sphi %s1015_s17, %s22_s17   ;;  %s969_s16 = sphi %s1013_s16, %s1314_s16   ;;  %s965_s15 = sphi %s1011_s15, %s1313_s15   ;;  %s961_s14 = sphi %s1009_s14, %s1309_s14   ;;  %s957_s13 = sphi %s1007_s13, %s1312_s13   ;;  %s953_s12 = sphi %s1005_s12, %s1311_s12  }
   0xb   : > { %s659_s19 = sadd.s32 4294967294, %s973_s17   ;;  %s41_s20 = sadd.s32 1, %s969_s16 }
   0xc   : > { %s50_s21 = sadd.s32 1, %s961_s14  ;;  %p43_p0 = scmp.ge.s32.totalorder %s41_s20, 2 }
   0xd   : > { %p57_p1 = scmp.ne.s32.totalorder %s961_s14, %s957_s13  ;;  %p58_p2 = scmp.eq.s32.totalorder %s973_s17, 0 }
   0xe   : > { %p63_p3 = scmp.ne.s32.totalorder %s957_s13, %s953_s12  ;;  %s1316_s20 = smov (%p43_p0, %s41_s20), 0 }
   0xf   : > { %1291 = sst [smem:[#allocation15_spill]] %s1316_s20  ;;  %p1048_p4 = por %p58_p2, %p57_p1 }
  0x10   : > { %p64_p5 = scmp.eq.s32.totalorder %s1036_s18, 0  ;;  %s45_s23 = ssub.s32 %s969_s16, %s1316_s20 }
  0x11   : > { %p145_p6 = scmp.eq.s32.totalorder %s1036_s18, 1  ;;  %p48_p7 = scmp.eq.s32.totalorder %s45_s23, 0 }
  0x12   : > { %p1056_p8 = por %p64_p5, %p63_p3  ;;  %p151_p10 = scmp.eq.s32.totalorder %s659_s19, 1 }
  0x13   : > { %p1060_p9 = por %p145_p6, %p57_p1  ;;  %p734_p13 = scmp.lt.s32.totalorder %s973_s17, 2 }
  0x14   : > { %s1293_s24 = scalar_select %p1056_p8, 1, 0 }
  0x15   : > { %s1294_s25 = scalar_select %p1060_p9, 1, 0 }
  0x16   : > { %s1065_s26 = scalar_select %p48_p7, %s961_s14, %s50_s21  }
  0x17   : > { %p1067_p11 = por %p151_p10, %p63_p3  ;;  %s1074_s28 = sand.u32 1, %s961_s14  }
  0x18   : > { %1295 = sst [smem:[#allocation16_spill]] %s1065_s26  ;;  %s190_s29 = sand.u32 1, %s973_s17  }
  0x19   : > { %s1296_s27 = scalar_select %p1067_p11, 1, 0 }
  0x1a   : > { %s664_s30 = sshll.u32 %s1074_s28, 4  ;;  %p1080_p0 = pnand %p734_p13, %p1048_p4 }
  0x1b   : > { %s683_s5 = sshll.u32 %s969_s16, 8  ;;  %s1298_s1 = sld [smem:[#allocation17_spill]] }
  0x1c   : > { %s1297_s4 = scalar_select %p1080_p0, 1, 0 }
  0x1d   : > { %s194_s9 = scalar_lea.vmem [#allocation7], %s664_s30  ;;  %s1096_s11 = scalar_lea.sflag [#allocation8], %s190_s29 }
  0x1e   : > { %s203_s10 = sshll.u32 %s194_s9, 4  ;;  %p1102_p2 = pneg %p1080_p0  ;;  %s1094_s10 = int_to_ptr.vmem [resolvable:$true] %s203_s10 }
  0x21   : > { %s1090_s8 = scalar_lea.hbm %s1298_s1, %s683_s5  ;;  %s802_s6 = scalar_lea.hbm %s1298_s1, 512 }
  0x22   : > { %s797_s19 = scalar_lea.hbm %s1090_s8, 256  ;;  %p803_p5 = scmp.lt.u32.totalorder %s1090_s8, %s1298_s1 }
  0x23   : > { %p798_p1 = scmp.ne.s32.totalorder %s1090_s8, %s797_s19  ;;  %p804_p6 = scmp.lt.u32.totalorder %s802_s6, %s797_s19 }
  0x24   : > { %p806_p10 = scmp.lt.u32.totalorder %s797_s19, %s1090_s8 }
  0x25   : > { %p800_p3 = pnand %p1102_p2, %p798_p1  ;;  %p805_p7 = por %p804_p6, %p803_p5 }
  0x27   : > { %p801_p4 = pneg %p800_p3  ;;  %p807_p13 = por %p806_p10, %p805_p7 }
  0x29   : > { %p808_p12 = pnand %p807_p13, %p801_p4 }
  0x2b   : > { %811 = shalt.err (!%p808_p12)
}
  0x2c   : > { %s812_s29 = scalar_lea.vmem %s1094_s10, 256  ;;  %s975_s22 = smov [#allocation7]  }
  0x2d   : > { %p813_p1 = scmp.ne.s32.totalorder %s1094_s10, %s812_s29  ;;  %s817_s23 = sshll.u32 %s975_s22, 4  ;;  %s818_s23 = int_to_ptr.vmem [resolvable:$false] %s817_s23 }
  0x2e   : > { %s819_s7 = scalar_lea.vmem %s818_s23, 512  ;;  %p820_p9 = scmp.lt.s32.totalorder %s1094_s10, %s818_s23 }
  0x2f   : > { %p815_p3 = pnand %p813_p1, %p1102_p2  ;;  %p821_p8 = scmp.lt.s32.totalorder %s819_s7, %s812_s29 }
  0x31   : > { %p816_p11 = pneg %p815_p3  ;;  %p822_p5 = por %p821_p8, %p820_p9 }
  0x33   : > { %p823_p6 = pnand %p822_p5, %p816_p11 }
  0x35   : > { %826 = shalt.err (!%p823_p6)
}
  0x36   : > { %s1286_s19 = smov 128   ;;  %s977_s6 = smov 8  }
  0x37   : > { %726 = dma.hbm_to_vmem [thread:$0]  (!%p1080_p0), %s1090_s8, 256, %s1094_s10, %s1096_s11, %s1286_s19, %s1286_s19, %s977_s6  }
  0x38   : > { %s1134_s22 = scalar_lea.hbm %s1280_s2, %s683_s5  ;;  %p670_p8 = scmp.ge.s32.totalorder %s973_s17, 1 }
  0x39   : > { %s217_s23 = scalar_lea.vmem [#allocation9], %s664_s30  ;;  %p234_p9 = scmp.lt.s32.totalorder %s973_s17, 3 }
  0x3a   : > { %s226_s7 = sshll.u32 %s217_s23, 4  ;;  %s662_s20 = sshll.u32 %s1074_s28, 3  ;;  %s1151_s7 = int_to_ptr.vmem [resolvable:$true] %s226_s7 }
  0x3b   : > { %p1140_p11 = pnand %p670_p8, %p234_p9  ;;  %s663_s26 = sshll.u32 %s969_s16, 7 }
  0x3c   : > { %s1149_s10 = scalar_lea.hbm %s1278_s0, %s663_s26  ;;  %s175_s30 = scalar_lea.vmem [#allocation4], %s662_s20 }
  0x3d   : > { %s1300_s1 = scalar_select %p1140_p11, 1, 0 }
  0x3e   : > { %s183_s5 = sshll.u32 %s175_s30, 4  ;;  %s172_s9 = scalar_lea.sflag [#allocation5], %s1074_s28  ;;  %s184_s5 = int_to_ptr.vmem [resolvable:$true] %s183_s5 }
  0x3f   : > { %s827_s29 = scalar_lea.hbm %s1149_s10, 128  ;;  %s832_s14 = scalar_lea.hbm %s1278_s0, 256 }
  0x40   : > { %p828_p12 = scmp.ne.s32.totalorder %s1149_s10, %s827_s29  ;;  %p833_p10 = scmp.lt.u32.totalorder %s1149_s10, %s1278_s0 }
  0x41   : > { %p834_p13 = scmp.lt.u32.totalorder %s832_s14, %s827_s29  ;;  %p836_p3 = scmp.lt.u32.totalorder %s827_s29, %s1149_s10 }
  0x42   : > { %p830_p4 = pnand %p828_p12, %p1102_p2 }
  0x43   : > { %p835_p1 = por %p834_p13, %p833_p10 }
  0x44   : > { %p831_p7 = pneg %p830_p4 }
  0x45   : > { %p837_p5 = por %p836_p3, %p835_p1 }
  0x47   : > { %p838_p6 = pnand %p837_p5, %p831_p7 }
  0x49   : > { %841 = shalt.err (!%p838_p6)
}
  0x4a   : > { %s842_s20 = scalar_lea.vmem %s184_s5, 128  ;;  %s978_s28 = smov [#allocation4]  }
  0x4b   : > { %p843_p8 = scmp.ne.s32.totalorder %s184_s5, %s842_s20  ;;  %s847_s30 = sshll.u32 %s978_s28, 4  ;;  %s848_s30 = int_to_ptr.vmem [resolvable:$false] %s847_s30 }
  0x4c   : > { %s849_s19 = scalar_lea.vmem %s848_s30, 256  ;;  %p850_p4 = scmp.lt.s32.totalorder %s184_s5, %s848_s30 }
  0x4d   : > { %p845_p9 = pnand %p843_p8, %p1102_p2  ;;  %p851_p11 = scmp.lt.s32.totalorder %s849_s19, %s842_s20 }
  0x4f   : > { %p846_p12 = pneg %p845_p9  ;;  %p852_p0 = por %p851_p11, %p850_p4 }
  0x51   : > { %p853_p10 = pnand %p852_p0, %p846_p12 }
  0x53   : > { %856 = shalt.err (!%p853_p10)
}
  0x54   : > { %p1301_p13 = scmp.ne.s32.totalorder %s1297_s4, 0  ;;  %s857_s29 = scalar_lea.hbm %s1134_s22, 256 }
  0x55   : > { %p858_p7 = scmp.ne.s32.totalorder %s1134_s22, %s857_s29  ;;  %s862_s26 = scalar_lea.hbm %s1280_s2, 512 }
  0x56   : > { %723 = dma.hbm_to_vmem [thread:$0]  (!%p1301_p13), %s1149_s10, 128, %s184_s5, %s172_s9  }
  0x57   : > { %p860_p1 = pnand %p858_p7, %p1102_p2  ;;  %p863_p0 = scmp.lt.u32.totalorder %s1134_s22, %s1280_s2 }
  0x58   : > { %p864_p11 = scmp.lt.u32.totalorder %s862_s26, %s857_s29  ;;  %p866_p6 = scmp.lt.u32.totalorder %s857_s29, %s1134_s22 }
  0x59   : > { %p861_p3 = pneg %p860_p1 }
  0x5a   : > { %p865_p5 = por %p864_p11, %p863_p0 }
  0x5c   : > { %p867_p8 = por %p866_p6, %p865_p5 }
  0x5e   : > { %p868_p9 = pnand %p867_p8, %p861_p3 }
  0x60   : > { %871 = shalt.err (!%p868_p9)
}
  0x61   : > { %s872_s10 = scalar_lea.vmem %s1151_s7, 256  ;;  %s979_s5 = smov [#allocation9]  }
  0x62   : > { %p873_p12 = scmp.ne.s32.totalorder %s1151_s7, %s872_s10  ;;  %s877_s9 = sshll.u32 %s979_s5, 4  ;;  %s878_s9 = int_to_ptr.vmem [resolvable:$false] %s877_s9 }
  0x63   : > { %s879_s28 = scalar_lea.vmem %s878_s9, 512  ;;  %p880_p7 = scmp.lt.s32.totalorder %s1151_s7, %s878_s9 }
  0x64   : > { %p875_p4 = pnand %p873_p12, %p1102_p2  ;;  %p881_p1 = scmp.lt.s32.totalorder %s879_s28, %s872_s10 }
  0x66   : > { %p876_p10 = pneg %p875_p4  ;;  %p882_p0 = por %p881_p1, %p880_p7 }
  0x68   : > { %p883_p11 = pnand %p882_p0, %p876_p10 }
  0x6a   : > { %886 = shalt.err (!%p883_p11)
}
  0x6b   : > { %s1302_s30 = smov 128   ;;  %p1303_p2 = scmp.ne.s32.totalorder %s1300_s1, 0 }
  0x6c   : > { %729 = dma.hbm_to_vmem [thread:$0]  (!%p1301_p13), %s1134_s22, 256, %s1151_s7, %s1096_s11, %s1302_s30, %s1302_s30, %s977_s6  }
  0x6d   : > { %238 = sbr.rel (%p1303_p2) target bundleno = 699 (0x2bb), region = 32  ;;  %s1199_s21 = sand.u32 (!%p1303_p2), 1, %s957_s13  }
  0x6e   : > { %s671_s19 = sshll.u32 (!%p1303_p2), %s1199_s21, 3  ;;  %s241_s29 = scalar_lea.sflag (!%p1303_p2), [#allocation5], %s1199_s21 }
  0x6f   : > { %s244_s4 = scalar_lea.vmem (!%p1303_p2), [#allocation4], %s671_s19  ;;  %p1304_p3 = scmp.ne.s32.totalorder (!%p1303_p2), %s1293_s24, 0 }
  0x74   : > { %940 = dma.done.wait (%p1304_p3), %s241_s29, 128  }
  0x75   : > { %942 = vsyncadd (%p1304_p3), %s241_s29, 4294967168  ;;  %s249_s1 = sand.u32 1, %s1036_s18   ;;  %s672_s11 = sshll.u32 %s1199_s21, 4 }
  0x76   : > { %s250_s6 = scalar_lea.sflag [#allocation8], %s249_s1  ;;  %s253_s22 = scalar_lea.vmem [#allocation7], %s672_s11 }
  0x77   : > { %944 = dma.done.wait (%p1304_p3), %s250_s6, 512  }
  0x78   : > { %946 = vsyncadd (%p1304_p3), %s250_s6, 4294966784  ;;  %vm301_vm0 = vcmask 261120   ;;  %vm303_vm1 = vcmask 7168   ;;  %v980_v0 = vmov 0.0|0.0   ;;  %v981_v1 = vmov 0.0   ;;  %v306_v2 = vld [vmem:[%s253_s22] sm:$0xff] }
  0x79   : > { %705 = vmatprep.subr.bf16.mxu0 %v980_v0  ;;  %302 = vst.msk [vmem:[#allocation2] sm:$0xff] %vm301_vm0, %v981_v1  ;;  %709 = vmatprep.subr.bf16.mxu1 %v980_v0  ;;  %vm982_vm2 = vmmov 0   ;;  %v307_v3 = vld [vmem:[%s253_s22 + $0x8] sm:$0xff]  ;;  %vm707_vm3 = vmpackc.low %vm301_vm0, %vm301_vm0  ;;  %s262_s18 = scalar_lea.vmem [#allocation9], %s672_s11  ;;  %vm412_vm6 = vcmask 130048   ;;  %v983_v30 = vmov 0  }
  0x7a   : > { %304 = vst.msk [vmem:[#allocation3] sm:$0xff] %vm303_vm1, %v981_v1  ;;  %695 = vmatprep.mubr.msk.f32.mxu0 %vm982_vm2, %v981_v1  ;;  %702 = vmatprep.mubr.msk.f32.mxu1 %vm982_vm2, %v981_v1  ;;  %v706_v4 = vpack.c.bf16 %v307_v3, %v306_v2  ;;  %v305_v5 = vld [vmem:[%s244_s4] sm:$0xff]  ;;  %v308_v6 = vld [vmem:[%s262_s18] sm:$0xff]  ;;  %s680_s24 = sshll.u32 %s965_s15, 7  ;;  %s294_s7 = scalar_lea.vmem [#allocation10], %s671_s19 }
  0x7b   : > { %v309_v7 = vld [vmem:[%s262_s18 + $0x8] sm:$0xff]  ;;  %790 = vset.pattern.permute.xlu0 %v983_v30  ;;  %s526_s23 = sshll.u32 %s294_s7, 4  ;;  %s1228_s8 = scalar_lea.hbm %s1281_s3, %s680_s24  ;;  %s1230_s23 = int_to_ptr.vmem [resolvable:$true] %s526_s23 }
  0x7c   : > { %708 = vmatpush3.bf16.xpose.msk.msra.mxu0 %vm707_vm3, %v706_v4  ;;  %v710_v8 = vpack.c.bf16 %v309_v7, %v308_v6  ;;  %s512_s20 = scalar_lea.sflag [#allocation6], %s1199_s21  ;;  %s887_s15 = scalar_lea.vmem %s1230_s23, 128 }
  0x7d   : > { %p888_p13 = scmp.ne.s32.totalorder %s1230_s23, %s887_s15  ;;  %p1305_p5 = scmp.ne.s32.totalorder %s1294_s25, 0 }
  0x7e   : > { %711 = vmatpush3.bf16.msra.mxu1 %v710_v8  ;;  %s984_s10 = smov [#allocation10]  }
  0x7f   : > { %p889_p6 = pnand %p888_p13, %p1305_p5  ;;  %s891_s5 = sshll.u32 %s984_s10, 4  ;;  %s892_s5 = int_to_ptr.vmem [resolvable:$false] %s891_s5 }
  0x80   : > { %v419_v39 = vld [vmem:[#allocation2] sm:$0xff]  ;;  %s893_s9 = scalar_lea.vmem %s892_s5, 256  ;;  %p894_p9 = scmp.lt.s32.totalorder %s1230_s23, %s892_s5 }
  0x81   : > { %v411_v31 = vld [vmem:[#allocation3] sm:$0xff]  ;;  %p890_p8 = pneg %p889_p6  ;;  %p895_p12 = scmp.lt.s32.totalorder %s893_s9, %s887_s15 }
  0x83   : > { %696 = vmatmul.mubr.msk.f32.vlgmr.msra.gmra.mrb[0].mxu0 %vm301_vm0, %v305_v5  ;;  %p896_p4 = por %p895_p12, %p894_p9 }
  0x85   : > { %p897_p10 = pnand %p896_p4, %p890_p8 }
 0x156   : > { %v386_v9 = vpop.f32.mrb[0].mxu0 }
 0x157   : > { %v390_v10 = vmul.f32 0.17677669, %v386_v9  ;;  %v697_v11 = vpop.f32.mrb[1].mxu0 }
 0x159   : > { %v392_v12 = vsub.f32 0.0, %v390_v10  ;;  %v391_v24 = vmax.f32 %v390_v10, 0.0 }
 0x15b   : > { %v395_v13 = vand.u32 2147483647, %v392_v12  ;;  %vm393_vm5 = vcmp.ne.f32.partialorder %v392_v12, %v392_v12 }
 0x15d   : > { %v396_v14 = vsub.f32 0.0, %v395_v13 }
 0x15f   : > { %v397_v15 = vmul.f32 1.442695, %v396_v14 }
 0x161   : > { %791 = vpow2.f32 %v397_v15 }
 0x16b   : > { %v792_v16 = vpop.eup %791 }
 0x16c   : > { %v399_v17 = vadd.f32 1.0, %v792_v16  ;;  %v402_v18 = vmul.f32 -0.5, %v792_v16  ;;  %v405_v20 = vand.u32 2147483647, %v792_v16 }
 0x16e   : > { %793 = vlog2.f32 %v399_v17  ;;  %v403_v19 = vadd.f32 1.0, %v402_v18  ;;  %vm406_vm4 = vcmp.lt.f32.partialorder %v405_v20, 0.0004427343 }
 0x170   : > { %v404_v23 = vmul.f32 %v792_v16, %v403_v19 }
 0x178   : > { %v794_v21 = vpop.eup %793 }
 0x179   : > { %v401_v22 = vmul.f32 0.6931472, %v794_v21 }
 0x17b   : > { %v407_v25 = vsel %vm406_vm4, %v404_v23, %v401_v22 }
 0x17c   : > { %v408_v26 = vadd.f32 %v407_v25, %v391_v24 }
 0x17e   : > { %v409_v27 = vsel %vm393_vm5, %v390_v10, %v408_v26 }
 0x17f   : > { %v410_v28 = vadd.f32 1e-08, %v409_v27 }
 0x181   : > { %703 = vmatmul.mubr.msk.f32.vlgmr.msra.gmra.mrb[0].mxu1 %vm412_vm6, %v410_v28  ;;  %v413_v29 = vsel %vm412_vm6, %v410_v28, 0.0 }
 0x182   : > { %414 = vadd.xlane.f32.xlu0 %v413_v29 }
 0x20f   : > { %v415_v32 = vpop.xlane.xlu0 %414 }
 0x210   : > { %v416_v33 = vadd.f32 %v415_v32, %v411_v31 }
 0x212   : > { %418 = vst.msk [vmem:[#allocation3] sm:$0xff] %vm303_vm1, %v416_v33 }
 0x219   : > { %v498_v34 = vld [vmem:[#allocation3] sm:$0xff] }
 0x21a   : > { %795 = vrcp.f32 %v498_v34 }
 0x224   : > { %v796_v35 = vpop.eup %795 }
 0x225   : > { %v500_v36 = vmul.f32 %v796_v35, %v498_v34 }
 0x227   : > { %v501_v37 = vsub.f32 2.0, %v500_v36 }
 0x229   : > { %v502_v38 = vmul.f32 %v796_v35, %v501_v37 }
 0x22b   : > { %506 = vperm.xlu0 %790, %v502_v38  }
 0x254   : > { %v489_v40 = vpop.f32.mrb[0].mxu1 }
 0x255   : > { %v493_v41 = vadd.f32 %v489_v40, %v419_v39  ;;  %v704_v42 = vpop.f32.mrb[1].mxu1 }
 0x257   : > { %494 = vst.msk [vmem:[#allocation2] sm:$0xff] %vm301_vm0, %v493_v41 }
 0x25e   : > { %v503_v44 = vld [vmem:[#allocation2] sm:$0xff] }
 0x2aa   : > { %v507_v43 = vpop.permute.xlu0 %506 }
 0x2ab   : > { %v509_v45 = vmul.f32 %v507_v43, %v503_v44 }
 0x2ad   : > { %510 = vst.msk [vmem:[%s294_s7] sm:$0xff] %vm301_vm0, %v509_v45 }
 0x2ae   : > { %900 = shalt.err (!%p897_p10)
}
 0x2af   : > { %s901_s28 = scalar_lea.hbm %s1228_s8, 128  ;;  %s905_s19 = scalar_lea.hbm %s1281_s3, 256 }
 0x2b0   : > { %p902_p7 = scmp.ne.s32.totalorder %s1228_s8, %s901_s28  ;;  %p906_p11 = scmp.lt.u32.totalorder %s1228_s8, %s1281_s3 }
 0x2b1   : > { %p907_p2 = scmp.lt.u32.totalorder %s905_s19, %s901_s28  ;;  %p909_p13 = scmp.lt.u32.totalorder %s901_s28, %s1228_s8 }
 0x2b2   : > { %p903_p1 = pnand %p902_p7, %p1305_p5 }
 0x2b3   : > { %p908_p3 = por %p907_p2, %p906_p11 }
 0x2b4   : > { %p904_p0 = pneg %p903_p1 }
 0x2b5   : > { %p910_p6 = por %p909_p13, %p908_p3 }
 0x2b7   : > { %p911_p8 = pnand %p910_p6, %p904_p0 }
 0x2b9   : > { %914 = shalt.err (!%p911_p8)
}
 0x2ba   : > { %718 = dma.vmem_to_hbm [thread:$0]  (%p1305_p5), %s1230_s23, 128, %s1228_s8, %s512_s20  }
 0x2bb PF: > { %s538_s1 = sand.u32 1, %s953_s12   ;;  %p1306_p9 = scmp.ne.s32.totalorder %s1296_s27, 0 }
 0x2bc   : > { %p1307_p12 = scmp.ge.s32.totalorder %s973_s17, 2  ;;  %s539_s11 = scalar_lea.sflag [#allocation6], %s538_s1 }
 0x2be   : > { %p731_p4 = pnand %p1307_p12, %p1306_p9 }
 0x2c0   : > { %948 = dma.done.wait (!%p731_p4), %s539_s11, 128  }
 0x2c1   : > { %950 = vsyncadd (!%p731_p4), %s539_s11, 4294967168  ;;  %s22_s17 = sadd.s32 1, %s973_s17   ;;  %s1308_s6 = sld [smem:[#allocation14_spill]] }
 0x2c2   : > { %p19_p10 = scmp.ge.s32.totalorder %s22_s17, 4   ;;  %s1309_s14 = sld [smem:[#allocation16_spill]] }
 0x2c3   : > { %s1310_s25 = sld [smem:[#allocation15_spill]]  ;;  %s1311_s12 = smov %s957_s13 }
 0x2c4   : > { %s1313_s15 = smov %s969_s16  ;;  %21 = sbr.rel (!%p19_p10) target bundleno = 10 (0xa), region = 109 }
 0x2c7   : > { %s1312_s13 = smov %s1308_s6 }
 0x2c9   : > { %s1314_s16 = smov %s1310_s25 }
 0x2cb   :  { %544 = vsyncpa [#allocation5], 1 }
 0x2cc   :  { %546 = vsyncpa [#allocation5 + $0x1], 1 }
 0x2cd   :  { %547 = vsyncpa [#allocation8], 1 }
 0x2ce   :  { %549 = vsyncpa [#allocation8 + $0x1], 1 }
 0x2cf   :  { %550 = vsyncpa [#allocation6], 1 }
 0x2d0   :  { %552 = vsyncpa [#allocation6 + $0x1], 1 }

</bundles_post_ra>
